<compile_context>
chip_gen: v7x
topology: tpu7x:2x2x1
jax: 0.10.0
libtpu: 0.0.40
codegen_flags: <defaults>
</compile_context>

<pallas_src>
import functools

import jax
import jax.numpy as jnp
from jax.experimental import pallas as pl
from jax.experimental.pallas import tpu as pltpu

NEG_SLOPE = 0.01  # nn.LeakyReLU() default negative_slope
G_FOLD = 8        # batch elements folded into lanes: 8 * 16 channels = 128 lanes


def _leaky(x):
    return jnp.where(x > 0, x, NEG_SLOPE * x)


def _block_kernel(x_ref, w1_ref, b1_ref, w2_ref, b2_ref, o_ref, *, K, L, pad, GB):
    """One grid step processes GB lane-folded groups (8 batch elements each).

    x_ref  : (GB, L + 4*pad, 128)  folded input, zero-padded by 2*pad per side
    w*_ref : (K, 128, 128)         block-diagonal per-tap weights
    b*_ref : (1, 128)              folded biases
    o_ref  : (GB, L, 128)
    """
    Lp = L + 2 * pad  # extended conv1 output rows == zero-padded-h rows for conv2

    # Hoist taps / biases out of the per-group loop.
    w1 = [w1_ref[t] for t in range(K)]
    w2 = [w2_ref[t] for t in range(K)]
    b1 = b1_ref[...]
    b2 = b2_ref[...]

    # Rows of the extended conv1 output that correspond to real (non-pad) h.
    row = jax.lax.broadcasted_iota(jnp.int32, (Lp, 1), 0)
    valid = jnp.logical_and(row >= pad, row < pad + L)

    for g in range(GB):  # static unroll; GB is small
        x_g = x_ref[g]                                     # (L + 4*pad, 128)

        # ---- conv1 over the extended Lp rows (no hpad scratch needed) ------
        acc1 = jnp.dot(x_g[0:Lp, :], w1[0], preferred_element_type=jnp.float32)
        for t in range(1, K):
            acc1 = acc1 + jnp.dot(x_g[t:t + Lp, :], w1[t],
                                  preferred_element_type=jnp.float32)
        h = _leaky(acc1 + b1)
        h = jnp.where(valid, h, 0.0)      # acts as the zero-padded conv1 output

        # ---- conv2 + residual + LeakyReLU -----------------------------------
        acc2 = jnp.dot(h[0:L, :], w2[0], preferred_element_type=jnp.float32)
        for t in range(1, K):
            acc2 = acc2 + jnp.dot(h[t:t + L, :], w2[t],
                                  preferred_element_type=jnp.float32)
        res = x_g[2 * pad:2 * pad + L, :].astype(jnp.float32)
        o_ref[g] = _leaky(res + acc2 + b2).astype(o_ref.dtype)


def block_forward(x, w1, b1, w2, b2):
    """x: (N, 16, L) NCL like PyTorch. w*: (Cout=16, Cin=16, K), b*: (16,)."""
    N, C, L = x.shape
    assert C == 16, "module is fixed at 16 channels"
    K = w1.shape[2]
    assert K % 2 == 1, "only odd kernel_size gives 'same' output (matches PyTorch)"
    pad = K // 2
    CF = G_FOLD * C            # 128 folded lanes
    Lp2 = L + 4 * pad          # input length after 2*pad zero-pad per side

    # ---- fold 8 batch elements into the lane dim: (N,C,L) -> (NG, Lp2, 128) -
    Np = ((N + G_FOLD - 1) // G_FOLD) * G_FOLD
    NG = Np // G_FOLD
    xb = x if Np == N else jnp.pad(x, ((0, Np - N), (0, 0), (0, 0)))
    x_f = jnp.transpose(xb, (0, 2, 1)).reshape(NG, G_FOLD, L, C)   # (NG,8,L,C)
    x_f = jnp.transpose(x_f, (0, 2, 1, 3)).reshape(NG, L, CF)      # (NG,L,128)
    x_f = jnp.pad(x_f, ((0, 0), (2 * pad, 2 * pad), (0, 0)))       # (NG,Lp2,128)

    # ---- block-diagonal per-tap weights: (K, 128, 128) ----------------------
    eye_g = jnp.eye(G_FOLD, dtype=w1.dtype)
    w1_t = jnp.transpose(w1, (2, 1, 0))                    # (K, Cin, Cout)
    w2_t = jnp.transpose(w2, (2, 1, 0))
    w1_bd = jnp.einsum('gh,tij->tgihj', eye_g, w1_t).reshape(K, CF, CF)
    w2_bd = jnp.einsum('gh,tij->tgihj', eye_g, w2_t).reshape(K, CF, CF)
    b1_f = jnp.tile(b1, G_FOLD).reshape(1, CF)
    b2_f = jnp.tile(b2, G_FOLD).reshape(1, CF)

    # ---- pick groups-per-grid-step: ~2 MiB input block, keep grid >= 2 ------
    target_bytes = 2 * 1024 * 1024
    per_group_bytes = Lp2 * CF * x.dtype.itemsize
    GB = max(1, min(NG, target_bytes // max(per_group_bytes, 1)))
    if NG >= 2:
        GB = min(GB, max(1, NG // 2))   # leave >= 2 grid steps for both v7x TCs
    while NG % GB:
        GB -= 1
    grid = (NG // GB,)

    kernel = functools.partial(_block_kernel, K=K, L=L, pad=pad, GB=GB)

    out_f = pl.pallas_call(
        kernel,
        out_shape=jax.ShapeDtypeStruct((NG, L, CF), x.dtype),
        grid_spec=pltpu.PrefetchScalarGridSpec(
            num_scalar_prefetch=0,
            grid=grid,
            in_specs=[
                pl.BlockSpec((GB, Lp2, CF), lambda n: (n, 0, 0)),
                pl.BlockSpec((K, CF, CF), lambda n: (0, 0, 0)),
                pl.BlockSpec((1, CF), lambda n: (0, 0)),
                pl.BlockSpec((K, CF, CF), lambda n: (0, 0, 0)),
                pl.BlockSpec((1, CF), lambda n: (0, 0)),
            ],
            out_specs=pl.BlockSpec((GB, L, CF), lambda n: (n, 0, 0)),
        ),
        compiler_params=pltpu.CompilerParams(
            dimension_semantics=("parallel",)),
    )(x_f, w1_bd, b1_f, w2_bd, b2_f)

    # ---- unfold back to (N, C, L) -------------------------------------------
    out = out_f.reshape(NG, L, G_FOLD, C)
    out = jnp.transpose(out, (0, 2, 1, 3)).reshape(Np, L, C)[:N]
    return jnp.transpose(out, (0, 2, 1))


# ---------------------------- pure-JAX reference ----------------------------
def _conv1d_ref(x, w, b, pad):
    # x: (N, C, L), w: (Cout, Cin, K), b: (Cout,)
    y = jax.lax.conv_general_dilated(
        x, w, window_strides=(1,), padding=[(pad, pad)],
        dimension_numbers=("NCH", "OIH", "NCH"))
    return y + b[None, :, None]


def _block_ref(x, w1, b1, w2, b2):
    pad = w1.shape[2] // 2
    h = _leaky(_conv1d_ref(x, w1, b1, pad))
    y = _conv1d_ref(h, w2, b2, pad)
    return _leaky(x + y)


if __name__ == "__main__":
    key = jax.random.PRNGKey(0)
    k_x, k_w1, k_b1, k_w2, k_b2 = jax.random.split(key, 5)

    # N=10 exercises the batch-fold padding path (padded to 16 -> 2 lane groups)
    N, C, L, K = 10, 16, 24, 3

    x = jax.random.normal(k_x, (N, C, L), dtype=jnp.float32)
    w1 = 0.1 * jax.random.normal(k_w1, (C, C, K), dtype=jnp.float32)
    b1 = 0.1 * jax.random.normal(k_b1, (C,), dtype=jnp.float32)
    w2 = 0.1 * jax.random.normal(k_w2, (C, C, K), dtype=jnp.float32)
    b2 = 0.1 * jax.random.normal(k_b2, (C,), dtype=jnp.float32)

    y = block_forward(x, w1, b1, w2, b2)
    jax.block_until_ready(y)

    y_ref = _block_ref(x, w1, b1, w2, b2)
    assert y.shape == (N, C, L)
    assert jnp.allclose(y, y_ref, atol=1e-4, rtol=1e-4), "mismatch vs reference"

    print("KERNEL_OK")
</pallas_src>

<mosaic_0001>
module attributes {stable_mosaic.version = 11 : i64} {
  func.func @_block_kernel(%arg0: i32, %arg1: memref<1x28x128xf32, #tpu.memory_space<vmem>>, %arg2: memref<3x128x128xf32, #tpu.memory_space<vmem>>, %arg3: memref<1x128xf32, #tpu.memory_space<vmem>>, %arg4: memref<3x128x128xf32, #tpu.memory_space<vmem>>, %arg5: memref<1x128xf32, #tpu.memory_space<vmem>>, %arg6: memref<1x24x128xf32, #tpu.memory_space<vmem>>) attributes {dimension_semantics = [#tpu.dimension_semantics<parallel>], iteration_bounds = array<i64: 2>, scalar_prefetch = 0 : i64, scratch_operands = 0 : i64, tpu.core_type = #tpu.core_type<tc>, window_params = [{transform_indices = @transform_0, window_bounds = array<i64: 1, 28, 128>}, {pipeline_mode = #tpu.pipeline_mode<synchronous>, transform_indices = @transform_1, window_bounds = array<i64: 3, 128, 128>}, {pipeline_mode = #tpu.pipeline_mode<synchronous>, transform_indices = @transform_2, window_bounds = array<i64: 1, 128>}, {pipeline_mode = #tpu.pipeline_mode<synchronous>, transform_indices = @transform_3, window_bounds = array<i64: 3, 128, 128>}, {pipeline_mode = #tpu.pipeline_mode<synchronous>, transform_indices = @transform_4, window_bounds = array<i64: 1, 128>}, {transform_indices = @transform_5, window_bounds = array<i64: 1, 24, 128>}]} {
    %c0 = arith.constant 0 : index
    %c0_0 = arith.constant 0 : index
    %c0_1 = arith.constant 0 : index
    %0 = vector.load %arg2[%c0, %c0_0, %c0_1] : memref<3x128x128xf32, #tpu.memory_space<vmem>>, vector<1x128x128xf32>
    %1 = vector.shape_cast %0 : vector<1x128x128xf32> to vector<128x128xf32>
    %c1 = arith.constant 1 : index
    %c0_2 = arith.constant 0 : index
    %c0_3 = arith.constant 0 : index
    %2 = vector.load %arg2[%c1, %c0_2, %c0_3] : memref<3x128x128xf32, #tpu.memory_space<vmem>>, vector<1x128x128xf32>
    %3 = vector.shape_cast %2 : vector<1x128x128xf32> to vector<128x128xf32>
    %c2 = arith.constant 2 : index
    %c0_4 = arith.constant 0 : index
    %c0_5 = arith.constant 0 : index
    %4 = vector.load %arg2[%c2, %c0_4, %c0_5] : memref<3x128x128xf32, #tpu.memory_space<vmem>>, vector<1x128x128xf32>
    %5 = vector.shape_cast %4 : vector<1x128x128xf32> to vector<128x128xf32>
    %c0_6 = arith.constant 0 : index
    %c0_7 = arith.constant 0 : index
    %c0_8 = arith.constant 0 : index
    %6 = vector.load %arg4[%c0_6, %c0_7, %c0_8] : memref<3x128x128xf32, #tpu.memory_space<vmem>>, vector<1x128x128xf32>
    %7 = vector.shape_cast %6 : vector<1x128x128xf32> to vector<128x128xf32>
    %c1_9 = arith.constant 1 : index
    %c0_10 = arith.constant 0 : index
    %c0_11 = arith.constant 0 : index
    %8 = vector.load %arg4[%c1_9, %c0_10, %c0_11] : memref<3x128x128xf32, #tpu.memory_space<vmem>>, vector<1x128x128xf32>
    %9 = vector.shape_cast %8 : vector<1x128x128xf32> to vector<128x128xf32>
    %c2_12 = arith.constant 2 : index
    %c0_13 = arith.constant 0 : index
    %c0_14 = arith.constant 0 : index
    %10 = vector.load %arg4[%c2_12, %c0_13, %c0_14] : memref<3x128x128xf32, #tpu.memory_space<vmem>>, vector<1x128x128xf32>
    %11 = vector.shape_cast %10 : vector<1x128x128xf32> to vector<128x128xf32>
    %c0_15 = arith.constant 0 : index
    %c0_16 = arith.constant 0 : index
    %12 = vector.load %arg3[%c0_15, %c0_16] : memref<1x128xf32, #tpu.memory_space<vmem>>, vector<1x128xf32>
    %c0_17 = arith.constant 0 : index
    %c0_18 = arith.constant 0 : index
    %13 = vector.load %arg5[%c0_17, %c0_18] : memref<1x128xf32, #tpu.memory_space<vmem>>, vector<1x128xf32>
    %14 = tpu.iota {dimensions = array<i32: 0>} : vector<26x1xi32>
    %c1_i32 = arith.constant 1 : i32
    %15 = vector.broadcast %c1_i32 : i32 to vector<26x1xi32>
    %16 = arith.cmpi sge, %14, %15 : vector<26x1xi32>
    %c25_i32 = arith.constant 25 : i32
    %17 = vector.broadcast %c25_i32 : i32 to vector<26x1xi32>
    %18 = arith.cmpi slt, %14, %17 : vector<26x1xi32>
    %19 = arith.andi %16, %18 : vector<26x1xi1>
    %c0_19 = arith.constant 0 : index
    %c0_20 = arith.constant 0 : index
    %c0_21 = arith.constant 0 : index
    %20 = vector.load %arg1[%c0_19, %c0_20, %c0_21] : memref<1x28x128xf32, #tpu.memory_space<vmem>>, vector<1x28x128xf32>
    %21 = vector.shape_cast %20 : vector<1x28x128xf32> to vector<28x128xf32>
    %22 = vector.extract_strided_slice %21 {offsets = [0, 0], sizes = [26, 128], strides = [1, 1]} : vector<28x128xf32> to vector<26x128xf32>
    %cst = arith.constant dense<0.000000e+00> : vector<26x128xf32>
    %23 = tpu.matmul %22, %1, %cst {dimension_numbers = #tpu.dot_dimension_numbers<[1], [0], [0], [1], [0, 0, 1, 1], [], []>} : vector<26x128xf32>, vector<128x128xf32>, vector<26x128xf32> -> vector<26x128xf32>
    %24 = vector.extract_strided_slice %21 {offsets = [1, 0], sizes = [26, 128], strides = [1, 1]} : vector<28x128xf32> to vector<26x128xf32>
    %cst_22 = arith.constant dense<0.000000e+00> : vector<26x128xf32>
    %25 = tpu.matmul %24, %3, %cst_22 {dimension_numbers = #tpu.dot_dimension_numbers<[1], [0], [0], [1], [0, 0, 1, 1], [], []>} : vector<26x128xf32>, vector<128x128xf32>, vector<26x128xf32> -> vector<26x128xf32>
    %26 = arith.addf %23, %25 : vector<26x128xf32>
    %27 = vector.extract_strided_slice %21 {offsets = [2, 0], sizes = [26, 128], strides = [1, 1]} : vector<28x128xf32> to vector<26x128xf32>
    %cst_23 = arith.constant dense<0.000000e+00> : vector<26x128xf32>
    %28 = tpu.matmul %27, %5, %cst_23 {dimension_numbers = #tpu.dot_dimension_numbers<[1], [0], [0], [1], [0, 0, 1, 1], [], []>} : vector<26x128xf32>, vector<128x128xf32>, vector<26x128xf32> -> vector<26x128xf32>
    %29 = arith.addf %26, %28 : vector<26x128xf32>
    %30 = vector.broadcast %12 : vector<1x128xf32> to vector<26x128xf32>
    %31 = arith.addf %29, %30 : vector<26x128xf32>
    %cst_24 = arith.constant 0.000000e+00 : f32
    %32 = vector.broadcast %cst_24 : f32 to vector<26x128xf32>
    %33 = arith.cmpf ogt, %31, %32 : vector<26x128xf32>
    %cst_25 = arith.constant 0.00999999977 : f32
    %34 = vector.broadcast %cst_25 : f32 to vector<26x128xf32>
    %35 = arith.mulf %34, %31 : vector<26x128xf32>
    %36 = arith.select %33, %31, %35 : vector<26x128xi1>, vector<26x128xf32>
    %cst_26 = arith.constant 0.000000e+00 : f32
    %37 = vector.shape_cast %19 : vector<26x1xi1> to vector<26x1xi1>
    %38 = vector.broadcast %37 : vector<26x1xi1> to vector<26x128xi1>
    %39 = vector.broadcast %cst_26 : f32 to vector<26x128xf32>
    %40 = arith.select %38, %36, %39 : vector<26x128xi1>, vector<26x128xf32>
    %41 = vector.extract_strided_slice %40 {offsets = [0, 0], sizes = [24, 128], strides = [1, 1]} : vector<26x128xf32> to vector<24x128xf32>
    %cst_27 = arith.constant dense<0.000000e+00> : vector<24x128xf32>
    %42 = tpu.matmul %41, %7, %cst_27 {dimension_numbers = #tpu.dot_dimension_numbers<[1], [0], [0], [1], [0, 0, 1, 1], [], []>} : vector<24x128xf32>, vector<128x128xf32>, vector<24x128xf32> -> vector<24x128xf32>
    %43 = vector.extract_strided_slice %40 {offsets = [1, 0], sizes = [24, 128], strides = [1, 1]} : vector<26x128xf32> to vector<24x128xf32>
    %cst_28 = arith.constant dense<0.000000e+00> : vector<24x128xf32>
    %44 = tpu.matmul %43, %9, %cst_28 {dimension_numbers = #tpu.dot_dimension_numbers<[1], [0], [0], [1], [0, 0, 1, 1], [], []>} : vector<24x128xf32>, vector<128x128xf32>, vector<24x128xf32> -> vector<24x128xf32>
    %45 = arith.addf %42, %44 : vector<24x128xf32>
    %46 = vector.extract_strided_slice %40 {offsets = [2, 0], sizes = [24, 128], strides = [1, 1]} : vector<26x128xf32> to vector<24x128xf32>
    %cst_29 = arith.constant dense<0.000000e+00> : vector<24x128xf32>
    %47 = tpu.matmul %46, %11, %cst_29 {dimension_numbers = #tpu.dot_dimension_numbers<[1], [0], [0], [1], [0, 0, 1, 1], [], []>} : vector<24x128xf32>, vector<128x128xf32>, vector<24x128xf32> -> vector<24x128xf32>
    %48 = arith.addf %45, %47 : vector<24x128xf32>
    %49 = vector.extract_strided_slice %21 {offsets = [2, 0], sizes = [24, 128], strides = [1, 1]} : vector<28x128xf32> to vector<24x128xf32>
    %50 = arith.addf %49, %48 : vector<24x128xf32>
    %51 = vector.broadcast %13 : vector<1x128xf32> to vector<24x128xf32>
    %52 = arith.addf %50, %51 : vector<24x128xf32>
    %cst_30 = arith.constant 0.000000e+00 : f32
    %53 = vector.broadcast %cst_30 : f32 to vector<24x128xf32>
    %54 = arith.cmpf ogt, %52, %53 : vector<24x128xf32>
    %cst_31 = arith.constant 0.00999999977 : f32
    %55 = vector.broadcast %cst_31 : f32 to vector<24x128xf32>
    %56 = arith.mulf %55, %52 : vector<24x128xf32>
    %57 = arith.select %54, %52, %56 : vector<24x128xi1>, vector<24x128xf32>
    %c0_32 = arith.constant 0 : index
    %c0_33 = arith.constant 0 : index
    %c0_34 = arith.constant 0 : index
    %58 = vector.load %arg6[%c0_32, %c0_33, %c0_34] : memref<1x24x128xf32, #tpu.memory_space<vmem>>, vector<1x24x128xf32>
    %59 = vector.shape_cast %58 : vector<1x24x128xf32> to vector<24x128xf32>
    %60 = vector.shape_cast %57 : vector<24x128xf32> to vector<1x24x128xf32>
    tpu.vector_store %arg6[%c0_32, %c0_33, %c0_34], %60 {strides = array<i32>} : memref<1x24x128xf32, #tpu.memory_space<vmem>>, vector<1x24x128xf32>,
    return
  }
  func.func @transform_0(%arg0: i32) -> (i32, i32, i32) {
    %c0_i32 = arith.constant 0 : i32
    %c0_i32_0 = arith.constant 0 : i32
    %c0_i32_1 = arith.constant 0 : i32
    return %arg0, %c0_i32, %c0_i32_0 : i32, i32, i32
  }
  func.func @transform_1(%arg0: i32) -> (i32, i32, i32) {
    %c0_i32 = arith.constant 0 : i32
    %c0_i32_0 = arith.constant 0 : i32
    %c0_i32_1 = arith.constant 0 : i32
    %c0_i32_2 = arith.constant 0 : i32
    return %c0_i32, %c0_i32_0, %c0_i32_1 : i32, i32, i32
  }
  func.func @transform_2(%arg0: i32) -> (i32, i32) {
    %c0_i32 = arith.constant 0 : i32
    %c0_i32_0 = arith.constant 0 : i32
    %c0_i32_1 = arith.constant 0 : i32
    return %c0_i32, %c0_i32_0 : i32, i32
  }
  func.func @transform_3(%arg0: i32) -> (i32, i32, i32) {
    %c0_i32 = arith.constant 0 : i32
    %c0_i32_0 = arith.constant 0 : i32
    %c0_i32_1 = arith.constant 0 : i32
    %c0_i32_2 = arith.constant 0 : i32
    return %c0_i32, %c0_i32_0, %c0_i32_1 : i32, i32, i32
  }
  func.func @transform_4(%arg0: i32) -> (i32, i32) {
    %c0_i32 = arith.constant 0 : i32
    %c0_i32_0 = arith.constant 0 : i32
    %c0_i32_1 = arith.constant 0 : i32
    return %c0_i32, %c0_i32_0 : i32, i32
  }
  func.func @transform_5(%arg0: i32) -> (i32, i32, i32) {
    %c0_i32 = arith.constant 0 : i32
    %c0_i32_0 = arith.constant 0 : i32
    %c0_i32_1 = arith.constant 0 : i32
    return %arg0, %c0_i32, %c0_i32_0 : i32, i32, i32
  }
}

</mosaic_0001>

<bundles_post_ra>
// kernel: tpu_custom_call.1
= control target key start
LH: loop header
LB: loop body
LE: loop exit
PB: predicated region body
PF: predicated region fallthrough
CT: control target
= control target key end

     0   :  { %10 = vsyncpa [#allocation3], 0  ;;  %s2202_s0 = inlined_call_operand.vmem [shape: f32[2,28,128], index: 0, kind: input, shape index: {}]   ;;  %s2203_s1 = inlined_call_operand.hbm [shape: f32[3,128,128], index: 1, kind: input, shape index: {}]   ;;  %s2204_s2 = inlined_call_operand.vmem [shape: f32[1,128], index: 2, kind: input, shape index: {}]   ;;  %s2205_s3 = inlined_call_operand.hbm [shape: f32[3,128,128], index: 3, kind: input, shape index: {}]   ;;  %s2206_s4 = inlined_call_operand.vmem [shape: f32[1,128], index: 4, kind: input, shape index: {}]   ;;  %s2207_s5 = inlined_call_operand.hbm [shape: f32[2,24,128], index: 5, kind: output, shape index: {}]  }
   0x1   :  { %11 = vsyncpa [#allocation6], 0 }
   0x2   :  { %12 = vsyncpa [#allocation4], 0 }
   0x3   :  { %14 = vsyncpa [#allocation4 + $0x1], 0  ;;  %s1901_s18 = smov 0   ;;  %s1903_s19 = smov 0  }
   0x4   :  { %s1905_s20 = smov 0   ;;  %s1907_s21 = smov 0  }
   0x5 LB: > { %s1922_s22 = sadd.s32 4294967295, %s1859_s21   ;;  %s1105_s23 = sadd.s32 4294967294, %s1859_s21   ;;  %s1859_s21 = sphi %s1907_s21, %s2225_s21   ;;  %s1855_s20 = sphi %s1905_s20, %s2224_s20   ;;  %s1851_s19 = sphi %s1903_s19, %s2223_s19   ;;  %s1847_s18 = sphi %s1901_s18, %s2222_s18  }
   0x6   : > { %s1926_s24 = sadd.s32 1, %s1859_s21   ;;  %s137_s25 = sadd.s32 1, %s1855_s20 }
   0x7   : > { %s134_s26 = ssub.s32 %s1859_s21, %s1926_s24  ;;  %p147_p0 = scmp.ne.s32.totalorder %s1855_s20, %s1851_s19 }
   0x8   : > { %p135_p1 = scmp.eq.s32.totalorder %s134_s26, 0  ;;  %p148_p2 = scmp.eq.s32.totalorder %s1922_s22, 1 }
   0x9   : > { %p153_p3 = scmp.ne.s32.totalorder %s1851_s19, %s1847_s18  ;;  %p154_p4 = scmp.eq.s32.totalorder %s1105_s23, 1 }
   0xa   : > { %s1937_s27 = scalar_select %p135_p1, %s1855_s20, %s137_s25  }
   0xb   : > { %p1939_p5 = por %p148_p2, %p147_p0  ;;  %p1943_p6 = por %p154_p4, %p153_p3 }
   0xc   : > { %p1106_p7 = scmp.ge.s32.totalorder %s1859_s21, 1  ;;  %p161_p8 = scmp.lt.s32.totalorder %s1859_s21, 3 }
   0xd   : > { %s2211_s28 = scalar_select %p1939_p5, 1, 0 }
   0xe   : > { %s2212_s29 = scalar_select %p1943_p6, 1, 0 }
   0xf   : > { %p2208_p9 = scmp.eq.s32.totalorder %s1922_s22, 0  ;;  %p1950_p10 = pnand %p1106_p7, %p161_p8 }
  0x10   : > { %s1861_s6 = smov [#allocation2]   ;;  %s1862_s9 = smov [#allocation5]  }
  0x11   : > { %s2213_s30 = scalar_select %p1950_p10, 1, 0 }
  0x12   : > { %s173_s7 = sshll.u32 %s1861_s6, 4  ;;  %p1676_p11 = pneg %p1950_p10  ;;  %s174_s7 = int_to_ptr.vmem [resolvable:$true] %s173_s7 }
  0x13   : > { %s189_s10 = sshll.u32 %s1862_s9, 4  ;;  %s1733_s13 = scalar_lea.hbm %s2203_s1, 6144  ;;  %s1962_s10 = int_to_ptr.vmem [resolvable:$true] %s189_s10 }
  0x14   : > { %p1958_p12 = pnand %p2208_p9, %p1676_p11  ;;  %p1734_p13 = scmp.ne.s32.totalorder %s2203_s1, %s1733_s13 }
  0x15   : > { %p1740_p3 = scmp.lt.u32.totalorder %s1733_s13, %s2203_s1 }
  0x16   : > { %p1735_p0 = pneg %p1958_p12 }
  0x18   : > { %p1736_p1 = pnand %p1735_p0, %p1734_p13 }
  0x1a   : > { %p1737_p2 = pneg %p1736_p1 }
  0x1c   : > { %p1742_p4 = pnand %p1740_p3, %p1737_p2 }
  0x1e   : > { %1745 = shalt.err (!%p1742_p4)
}
  0x1f   : > { %s1746_s23 = scalar_lea.vmem %s174_s7, 6144  ;;  %p1754_p9 = scmp.lt.s32.totalorder %s174_s7, %s174_s7 }
  0x20   : > { %p1747_p7 = scmp.ne.s32.totalorder %s174_s7, %s1746_s23  ;;  %p1755_p6 = scmp.lt.s32.totalorder %s1746_s23, %s1746_s23 }
  0x22   : > { %p1749_p8 = pnand %p1747_p7, %p1735_p0  ;;  %p1756_p5 = por %p1755_p6, %p1754_p9 }
  0x24   : > { %p1750_p11 = pneg %p1749_p8 }
  0x26   : > { %p1757_p10 = pnand %p1756_p5, %p1750_p11 }
  0x28   : > { %1760 = shalt.err (!%p1757_p10)
}
  0x29   : > { %s1863_s25 = smov 128   ;;  %s1864_s26 = smov 8  }
  0x2a   : > { %1679 = dma.hbm_to_vmem [thread:$0]  (!%p1958_p12), %s2203_s1, 6144, %s174_s7, [#allocation3], %s1863_s25, %s1863_s25, %s1864_s26  }
  0x2b   : > { %s1761_s13 = scalar_lea.hbm %s2205_s3, 6144 }
  0x2c   : > { %p1762_p13 = scmp.ne.s32.totalorder %s2205_s3, %s1761_s13  ;;  %p1768_p9 = scmp.lt.u32.totalorder %s1761_s13, %s2205_s3 }
  0x2e   : > { %p1764_p5 = pnand %p1762_p13, %p1735_p0 }
  0x30   : > { %p1765_p6 = pneg %p1764_p5 }
  0x32   : > { %p1770_p10 = pnand %p1768_p9, %p1765_p6 }
  0x34   : > { %1773 = shalt.err (!%p1770_p10)
}
  0x35   : > { %s1774_s7 = scalar_lea.vmem %s1962_s10, 6144  ;;  %p1782_p4 = scmp.lt.s32.totalorder %s1962_s10, %s1962_s10 }
  0x36   : > { %p1775_p1 = scmp.ne.s32.totalorder %s1962_s10, %s1774_s7  ;;  %p1783_p7 = scmp.lt.s32.totalorder %s1774_s7, %s1774_s7 }
  0x38   : > { %p1777_p2 = pnand %p1775_p1, %p1735_p0  ;;  %p1784_p8 = por %p1783_p7, %p1782_p4 }
  0x3a   : > { %p1778_p3 = pneg %p1777_p2 }
  0x3c   : > { %p1785_p11 = pnand %p1784_p8, %p1778_p3 }
  0x3e   : > { %1788 = shalt.err (!%p1785_p11)
}
  0x3f   : > { %1682 = dma.hbm_to_vmem [thread:$0]  (!%p1958_p12), %s2205_s3, 6144, %s1962_s10, [#allocation6], %s1863_s25, %s1863_s25, %s1864_s26  }
  0x40   : > { %p2215_p13 = scmp.ne.s32.totalorder %s2213_s30, 0 }
  0x41   : > { %p2216_p5 = scmp.eq.s32.totalorder (!%p2215_p13), %s1922_s22, 0 }
  0x42   : > { %216 = sbr.rel (%p2215_p13) target bundleno = 708 (0x2c4), region = 40 }
  0x49   : > { %1834 = dma.done.wait (%p2216_p5), [#allocation3], 6144   ;;  %p2217_p0 = pmov %p2216_p5 }
  0x4b   : > { %1836 = vsyncadd (%p2217_p0), [#allocation3], 4294961152  ;;  %p2218_p6 = pmov %p2217_p0 }
  0x4c   : > { %p2219_p9 = pmov %p2217_p0 }
  0x4d   : > { %1838 = dma.done.wait (%p2218_p6), [#allocation6], 6144  }
  0x4e   : > { %1840 = vsyncadd (%p2219_p9), [#allocation6], 4294961152  ;;  %p248_p10 = scmp.lt.s32.totalorder %s1922_s22, 1  ;;  %v1865_v0 = vmov 0.0|0.0   ;;  %v270_v1 = vld [vmem:[#allocation2 + $0x80] sm:$0xff]  ;;  %v271_v2 = vld [vmem:[#allocation2 + $0x88] sm:$0xff] }
  0x4f   : > { %1572 = vmatprep.subr.bf16.mxu1 %v1865_v0  ;;  %v272_v3 = vld [vmem:[#allocation2 + $0x90] sm:$0xff]  ;;  %v1476_v4 = vpack.c.bf16 %v271_v2, %v270_v1  ;;  %v273_v5 = vld [vmem:[#allocation2 + $0x98] sm:$0xff]  ;;  %v274_v7 = vld [vmem:[#allocation2 + $0xa0] sm:$0xff]  ;;  %vm380_vm0 = vcmask 1046528   ;;  %vm562_vm1 = vcmask 1045504   ;;  %vm1866_vm2 = vmmov 0  }
  0x50   : > { %s249_s30 = scalar_select %p248_p10, %s1922_s22, 1  ;;  %v1480_v6 = vpack.c.bf16 %v273_v5, %v272_v3  ;;  %v275_v8 = vld [vmem:[#allocation2 + $0xa8] sm:$0xff]  ;;  %v276_v12 = vld [vmem:[#allocation2 + $0xb0] sm:$0xff]  ;;  %v277_v13 = vld [vmem:[#allocation2 + $0xb8] sm:$0xff]  ;;  %vm967_vm9 = vcmask 1041408  }
  0x51   : > { %1477 = vmatprep.subr.bf16.mxu0 %v1476_v4  ;;  %v1484_v9 = vpack.c.bf16 %v275_v8, %v274_v7  ;;  %v1488_v17 = vpack.c.bf16 %v277_v13, %v276_v12  ;;  %v278_v18 = vld [vmem:[#allocation2 + $0xc0] sm:$0xff]  ;;  %v279_v19 = vld [vmem:[#allocation2 + $0xc8] sm:$0xff]  ;;  %v280_v21 = vld [vmem:[#allocation2 + $0xd0] sm:$0xff]  ;;  %s245_s12 = sand.u32 1, %s1851_s19   ;;  %s1665_s17 = smul.u32 384, %s1922_s22 }
  0x52   : > { %s1121_s8 = sshll.u32 %s249_s30, 5  ;;  %1479 = vmatpush3.bf16.msra.mxu0 %v1476_v4  ;;  %v1492_v20 = vpack.c.bf16 %v279_v19, %v278_v18  ;;  %v281_v22 = vld [vmem:[#allocation2 + $0xd8] sm:$0xff]  ;;  %v282_v24 = vld [vmem:[#allocation2 + $0xe0] sm:$0xff]  ;;  %v321_v26 = vld [vmem:[#allocation5 + $0x88] sm:$0xff]  ;;  %s1664_s15 = smul.u32 24, %s245_s12 }
  0x53   : > { %s2027_s26 = scalar_lea.vmem %s2202_s0, %s1121_s8  ;;  %1481 = vmatprep.subr.bf16.mxu0 %v1480_v6  ;;  %v1496_v23 = vpack.c.bf16 %v281_v22, %v280_v21  ;;  %v320_v25 = vld [vmem:[#allocation5 + $0x80] sm:$0xff]  ;;  %v283_v27 = vld [vmem:[#allocation2 + $0xe8] sm:$0xff]  ;;  %v322_v29 = vld [vmem:[#allocation5 + $0x90] sm:$0xff]  ;;  %s2157_s22 = scalar_lea.hbm %s2207_s5, %s1665_s17 }
  0x54   : > { %v2030_v10 = vld [vmem:[%s2027_s26] sm:$0xff]  ;;  %v2033_v11 = vld [vmem:[%s2027_s26 + $0x8] sm:$0xff]  ;;  %v1573_v28 = vpack.c.bf16 %v321_v26, %v320_v25  ;;  %v323_v30 = vld [vmem:[#allocation5 + $0x98] sm:$0xff]  ;;  %v1500_v32 = vpack.c.bf16 %v283_v27, %v282_v24  ;;  %s247_s16 = scalar_lea.vmem [#allocation7], %s1664_s15  ;;  %s2161_s30 = scalar_lea.sflag [#allocation4], %s245_s12 }
  0x55   : > { %v381_v14 = vrot.slane %v2030_v10, 1  ;;  %v382_v15 = vrot.slane %v2033_v11, 1  ;;  %v1576_v31 = vpack.c.bf16 %v323_v30, %v322_v29  ;;  %v324_v33 = vld [vmem:[#allocation5 + $0xa0] sm:$0xff]  ;;  %v325_v34 = vld [vmem:[#allocation5 + $0xa8] sm:$0xff]  ;;  %v284_v35 = vld [vmem:[#allocation2 + $0xf0] sm:$0xff]  ;;  %v564_v24 = vrot.slane %v2033_v11, 2 }
  0x56   : > { %1483 = vmatpush3.bf16.msra.mxu0 %v1480_v6  ;;  %1574 = vmatpush3.bf16.msra.mxu1 %v1573_v28  ;;  %v285_v36 = vld [vmem:[#allocation2 + $0xf8] sm:$0xff]  ;;  %v1579_v37 = vpack.c.bf16 %v325_v34, %v324_v33  ;;  %v2040_v39 = vld [vmem:[%s2027_s26 + $0x10] sm:$0xff]  ;;  %v253_v42 = vld [vmem:[#allocation2] sm:$0xff]  ;;  %s1021_s7 = sshll.u32 %s247_s16, 4  ;;  %p2220_p1 = scmp.ne.s32.totalorder %s2211_s28, 0  ;;  %s2152_s7 = int_to_ptr.vmem [resolvable:$true] %s1021_s7 }
  0x57   : > { %v383_v16 = vsel %vm380_vm0, %v381_v14, %v382_v15  ;;  %1485 = vmatprep.subr.bf16.mxu0 %v1484_v9  ;;  %1575 = vmatprep.subr.bf16.mxu1 %v1865_v0  ;;  %v1504_v38 = vpack.c.bf16 %v285_v36, %v284_v35  ;;  %v326_v40 = vld [vmem:[#allocation5 + $0xb0] sm:$0xff]  ;;  %v327_v41 = vld [vmem:[#allocation5 + $0xb8] sm:$0xff]  ;;  %v254_v43 = vld [vmem:[#allocation2 + $0x8] sm:$0xff]  ;;  %v384_v45 = vrot.slane %v2040_v39, 1  ;;  %s1789_s8 = scalar_lea.vmem %s2152_s7, 384  ;;  %s1868_s10 = smov [#allocation7]  }
  0x58   : > { %1271 = vmatprep.mubr.f32.mxu0 %v383_v16  ;;  %v2044_v44 = vld [vmem:[%s2027_s26 + $0x18] sm:$0xf]  ;;  %v1582_v46 = vpack.c.bf16 %v327_v41, %v326_v40  ;;  %v1508_v47 = vpack.c.bf16 %v254_v43, %v253_v42  ;;  %v255_v48 = vld [vmem:[#allocation2 + $0x10] sm:$0xff]  ;;  %v328_v51 = vld [vmem:[#allocation5 + $0xc0] sm:$0xff]  ;;  %p1790_p12 = scmp.ne.s32.totalorder %s2152_s7, %s1789_s8  ;;  %s1793_s25 = sshll.u32 %s1868_s10, 4  ;;  %s1794_s25 = int_to_ptr.vmem [resolvable:$false] %s1793_s25 }
  0x59   : > { %v386_v49 = vrot.slane %v2044_v44, 1  ;;  %v256_v50 = vld [vmem:[#allocation2 + $0x18] sm:$0xff]  ;;  %v329_v52 = vld [vmem:[#allocation5 + $0xc8] sm:$0xff]  ;;  %v385_v53 = vsel %vm380_vm0, %v382_v15, %v384_v45  ;;  %v257_v55 = vld [vmem:[#allocation2 + $0x20] sm:$0xff]  ;;  %s1795_s26 = scalar_lea.vmem %s1794_s25, 768  ;;  %p1796_p4 = scmp.lt.s32.totalorder %s2152_s7, %s1794_s25 }
  0x5a   : > { %1487 = vmatpush3.bf16.msra.mxu0 %v1484_v9  ;;  %1577 = vmatpush3.bf16.msra.mxu1 %v1576_v31  ;;  %v1512_v54 = vpack.c.bf16 %v256_v50, %v255_v48  ;;  %v1585_v57 = vpack.c.bf16 %v329_v52, %v328_v51  ;;  %v258_v58 = vld [vmem:[#allocation2 + $0x28] sm:$0xff]  ;;  %v330_v59 = vld [vmem:[#allocation5 + $0xd0] sm:$0xff]  ;;  %v331_v60 = vld [vmem:[#allocation5 + $0xd8] sm:$0xff]  ;;  %p1791_p2 = pnand %p1790_p12, %p2220_p1  ;;  %p1797_p7 = scmp.lt.s32.totalorder %s1795_s26, %s1789_s8 }
  0x5b   : > { %1489 = vmatprep.subr.bf16.mxu0 %v1488_v17  ;;  %1578 = vmatprep.subr.bf16.mxu1 %v1865_v0  ;;  %v387_v56 = vsel %vm380_vm0, %v384_v45, %v386_v49  ;;  %v1516_v61 = vpack.c.bf16 %v258_v58, %v257_v55  ;;  %v1588_v62 = vpack.c.bf16 %v331_v60, %v330_v59  ;;  %v259_v63 = vld [vmem:[#allocation2 + $0x30] sm:$0xff]  ;;  %v260_v1 = vld [vmem:[#allocation2 + $0x38] sm:$0xff]  ;;  %v261_v3 = vld [vmem:[#allocation2 + $0x40] sm:$0xff] }
  0x5c   : > { %v1520_v2 = vpack.c.bf16 %v260_v1, %v259_v63  ;;  %v262_v4 = vld [vmem:[#allocation2 + $0x48] sm:$0xff]  ;;  %v263_v6 = vld [vmem:[#allocation2 + $0x50] sm:$0xff]  ;;  %v264_v7 = vld [vmem:[#allocation2 + $0x58] sm:$0xff]  ;;  %p1792_p3 = pneg %p1791_p2  ;;  %p1798_p8 = por %p1797_p7, %p1796_p4 }
  0x5d   : > { %v1524_v5 = vpack.c.bf16 %v262_v4, %v261_v3  ;;  %v1528_v8 = vpack.c.bf16 %v264_v7, %v263_v6  ;;  %v265_v9 = vld [vmem:[#allocation2 + $0x60] sm:$0xff]  ;;  %v266_v12 = vld [vmem:[#allocation2 + $0x68] sm:$0xff]  ;;  %v267_v14 = vld [vmem:[#allocation2 + $0x70] sm:$0xff] }
  0x5e   : > { %1491 = vmatpush3.bf16.msra.mxu0 %v1488_v17  ;;  %1580 = vmatpush3.bf16.msra.mxu1 %v1579_v37  ;;  %v1532_v13 = vpack.c.bf16 %v266_v12, %v265_v9  ;;  %v268_v15 = vld [vmem:[#allocation2 + $0x78] sm:$0xff]  ;;  %v287_v17 = vld [vmem:[#allocation2 + $0x100] sm:$0xff]  ;;  %v288_v18 = vld [vmem:[#allocation2 + $0x108] sm:$0xff]  ;;  %p1799_p11 = pnand %p1798_p8, %p1792_p3 }
  0x5f   : > { %1493 = vmatprep.subr.bf16.mxu0 %v1492_v20  ;;  %1581 = vmatprep.subr.bf16.mxu1 %v1865_v0  ;;  %v1536_v16 = vpack.c.bf16 %v268_v15, %v267_v14  ;;  %v1540_v19 = vpack.c.bf16 %v288_v18, %v287_v17  ;;  %v290_v21 = vld [vmem:[#allocation2 + $0x118] sm:$0xff]  ;;  %v291_v25 = vld [vmem:[#allocation2 + $0x120] sm:$0xff]  ;;  %v292_v26 = vld [vmem:[#allocation2 + $0x128] sm:$0xff] }
  0x60   : > { %v1548_v27 = vpack.c.bf16 %v292_v26, %v291_v25  ;;  %v293_v29 = vld [vmem:[#allocation2 + $0x130] sm:$0xff]  ;;  %v294_v30 = vld [vmem:[#allocation2 + $0x138] sm:$0xff]  ;;  %v296_v33 = vld [vmem:[#allocation2 + $0x148] sm:$0xff] }
  0x61   : > { %v1552_v31 = vpack.c.bf16 %v294_v30, %v293_v29  ;;  %v297_v35 = vld [vmem:[#allocation2 + $0x150] sm:$0xff]  ;;  %v298_v36 = vld [vmem:[#allocation2 + $0x158] sm:$0xff]  ;;  %v300_v40 = vld [vmem:[#allocation2 + $0x168] sm:$0xff] }
  0x62   : > { %1495 = vmatpush3.bf16.msra.mxu0 %v1492_v20  ;;  %1583 = vmatpush3.bf16.msra.mxu1 %v1582_v46  ;;  %v289_v20 = vld [vmem:[#allocation2 + $0x110] sm:$0xff]  ;;  %v1560_v37 = vpack.c.bf16 %v298_v36, %v297_v35  ;;  %v302_v43 = vld [vmem:[#allocation2 + $0x178] sm:$0xff]  ;;  %v566_v46 = vrot.slane %v2040_v39, 2  ;;  %v332_v50 = vld [vmem:[#allocation5 + $0xe0] sm:$0xff] }
  0x63   : > { %1497 = vmatprep.subr.bf16.mxu0 %v1496_v23  ;;  %1584 = vmatprep.subr.bf16.mxu1 %v1865_v0  ;;  %v1544_v22 = vpack.c.bf16 %v290_v21, %v289_v20  ;;  %v301_v42 = vld [vmem:[#allocation2 + $0x170] sm:$0xff]  ;;  %v333_v51 = vld [vmem:[#allocation5 + $0xe8] sm:$0xff]  ;;  %v1115_v59 = vld [vmem:[%s2204_s2] ss:$0 sm:$0xff] }
  0x64   : > { %v1568_v45 = vpack.c.bf16 %v302_v43, %v301_v42  ;;  %v567_v48 = vsel %vm562_vm1, %v564_v24, %v566_v46  ;;  %v1591_v52 = vpack.c.bf16 %v333_v51, %v332_v50  ;;  %v303_v3 = vld [vmem:[#allocation5] sm:$0xff]  ;;  %v304_v4 = vld [vmem:[#allocation5 + $0x8] sm:$0xff]  ;;  %v309_v42 = vld [vmem:[#allocation5 + $0x30] sm:$0xff] }
  0x65   : > { %v1597_v15 = vpack.c.bf16 %v304_v4, %v303_v3  ;;  %v307_v36 = vld [vmem:[#allocation5 + $0x20] sm:$0xff]  ;;  %v310_v43 = vld [vmem:[#allocation5 + $0x38] sm:$0xff]  ;;  %v342_v4 = vld [vmem:[#allocation5 + $0x128] sm:$0xff] }
  0x66   : > { %1499 = vmatpush3.bf16.msra.mxu0 %v1496_v23  ;;  %1586 = vmatpush3.bf16.msra.mxu1 %v1585_v57  ;;  %v563_v23 = vrot.slane %v2030_v10, 2  ;;  %v355_v57 = vlaneseq  ;;  %v314_v50 = vld [vmem:[#allocation5 + $0x58] sm:$0xff]  ;;  %v341_v3 = vld [vmem:[#allocation5 + $0x120] sm:$0xff] }
  0x67   : > { %1501 = vmatprep.subr.bf16.mxu0 %v1500_v32  ;;  %1587 = vmatprep.subr.bf16.mxu1 %v1865_v0 }
  0x68   : > { %v565_v28 = vsel %vm562_vm1, %v563_v23, %v564_v24  ;;  %v2069_v58 = vshrl.u32 %v355_v57, 7  ;;  %v305_v23 = vld [vmem:[#allocation5 + $0x10] sm:$0xff]  ;;  %v306_v24 = vld [vmem:[#allocation5 + $0x18] sm:$0xff] }
  0x69   : > { %v318_v57 = vld [vmem:[#allocation5 + $0x78] sm:$0xff] }
  0x6a   : > { %1503 = vmatpush3.bf16.msra.mxu0 %v1500_v32  ;;  %1589 = vmatpush3.bf16.msra.mxu1 %v1588_v62  ;;  %v295_v32 = vld [vmem:[#allocation2 + $0x140] sm:$0xff]  ;;  %v359_v63 = vadd.s32 24, %v2069_v58  ;;  %vm360_vm4 = vcmp.ge.s32.totalorder %v2069_v58, 1  ;;  %v343_v58 = vld [vmem:[#allocation5 + $0x130] sm:$0xff] }
  0x6b   : > { %1505 = vmatprep.subr.bf16.mxu0 %v1504_v38  ;;  %1590 = vmatprep.subr.bf16.mxu1 %v1865_v0  ;;  %v1556_v34 = vpack.c.bf16 %v296_v33, %v295_v32  ;;  %v1600_v33 = vpack.c.bf16 %v306_v24, %v305_v23 }
  0x6c   : > { %vm367_vm6 = vcmp.lt.s32.totalorder %v359_v63, 25  ;;  %v339_v63 = vld [vmem:[#allocation5 + $0x110] sm:$0xff] }
  0x6e   : > { %1507 = vmatpush3.bf16.msra.mxu0 %v1504_v38  ;;  %v299_v38 = vld [vmem:[#allocation2 + $0x160] sm:$0xff]  ;;  %1592 = vmatpush3.bf16.msra.mxu1 %v1591_v52 }
  0x6f   : > { %1509 = vmatprep.subr.bf16.mxu0 %v1508_v47  ;;  %v1564_v41 = vpack.c.bf16 %v300_v40, %v299_v38  ;;  %1593 = vmatprep.subr.bf16.mxu1 %v1865_v0  ;;  %v315_v52 = vld [vmem:[#allocation5 + $0x60] sm:$0xff] }
  0x71   : > { %1272 = vmatmul.mubr.f32.vlgmr.msra.gmra.mrb[0].mxu0 %v385_v53  ;;  %v334_v53 = vld [vmem:[#allocation5 + $0xf0] sm:$0xff] }
  0x72   : > { %1511 = vmatpush3.bf16.msra.mxu0 %v1508_v47  ;;  %1274 = vmatprep.mubr.f32.mxu0 %v387_v56  ;;  %v568_v47 = vrot.slane %v2044_v44, 2  ;;  %v1867_v56 = vmov 0.0  }
  0x73   : > { %1513 = vmatprep.subr.bf16.mxu0 %v1512_v54  ;;  %1385 = vmatprep.mubr.msk.f32.mxu1 %vm1866_vm2, %v1867_v56 }
  0x75   : > { %1275 = vmatmul.mubr.f32.gmra.mrb[2].mxu0 %v386_v49  ;;  %v569_v49 = vsel %vm562_vm1, %v566_v46, %v568_v47  ;;  %v311_v46 = vld [vmem:[#allocation5 + $0x40] sm:$0xff] }
  0x76   : > { %1515 = vmatpush3.bf16.msra.mxu0 %v1512_v54  ;;  %1309 = vmatprep.mubr.f32.mxu0 %v2030_v10  ;;  %v335_v54 = vld [vmem:[#allocation5 + $0xf8] sm:$0xff] }
  0x77   : > { %1517 = vmatprep.subr.bf16.mxu0 %v1516_v61  ;;  %v1594_v55 = vpack.c.bf16 %v335_v54, %v334_v53  ;;  %v316_v53 = vld [vmem:[#allocation5 + $0x68] sm:$0xff] }
  0x78   : > { %v1615_v54 = vpack.c.bf16 %v316_v53, %v315_v52 }
  0x79   : > { %1595 = vmatpush3.bf16.msra.mxu1 %v1594_v55  ;;  %v317_v55 = vld [vmem:[#allocation5 + $0x70] sm:$0xff] }
  0x7a   : > { %1519 = vmatpush3.bf16.msra.mxu0 %v1516_v61  ;;  %1596 = vmatprep.subr.bf16.mxu1 %v1865_v0 }
  0x7b   : > { %1521 = vmatprep.subr.bf16.mxu0 %v1520_v2 }
  0x7e   : > { %1523 = vmatpush3.bf16.msra.mxu0 %v1520_v2 }
  0x7f   : > { %1525 = vmatprep.subr.bf16.mxu0 %v1524_v5 }
  0x82   : > { %1527 = vmatpush3.bf16.msra.mxu0 %v1524_v5 }
  0x83   : > { %1529 = vmatprep.subr.bf16.mxu0 %v1528_v8 }
  0x86   : > { %1531 = vmatpush3.bf16.msra.mxu0 %v1528_v8 }
  0x87   : > { %1533 = vmatprep.subr.bf16.mxu0 %v1532_v13 }
  0x8a   : > { %1535 = vmatpush3.bf16.msra.mxu0 %v1532_v13 }
  0x8b   : > { %1537 = vmatprep.subr.bf16.mxu0 %v1536_v16 }
  0x8e   : > { %1539 = vmatpush3.bf16.msra.mxu0 %v1536_v16 }
  0x8f   : > { %1541 = vmatprep.subr.bf16.mxu0 %v1540_v19 }
  0x91   : > { %1310 = vmatmul.mubr.f32.vlgmr.msra.gmra.mrb[0].mxu0 %v2033_v11 }
  0x92   : > { %1543 = vmatpush3.bf16.msra.mxu0 %v1540_v19  ;;  %1312 = vmatprep.mubr.f32.mxu0 %v2040_v39 }
  0x93   : > { %1545 = vmatprep.subr.bf16.mxu0 %v1544_v22 }
  0x95   : > { %1313 = vmatmul.mubr.f32.gmra.mrb[2].mxu0 %v2044_v44 }
  0x96   : > { %1547 = vmatpush3.bf16.msra.mxu0 %v1544_v22  ;;  %1347 = vmatprep.mubr.f32.mxu0 %v565_v28 }
  0x97   : > { %1549 = vmatprep.subr.bf16.mxu0 %v1548_v27 }
  0x9a   : > { %1551 = vmatpush3.bf16.msra.mxu0 %v1548_v27 }
  0x9b   : > { %1553 = vmatprep.subr.bf16.mxu0 %v1552_v31 }
  0x9e   : > { %1555 = vmatpush3.bf16.msra.mxu0 %v1552_v31 }
  0x9f   : > { %1557 = vmatprep.subr.bf16.mxu0 %v1556_v34 }
  0xa2   : > { %1559 = vmatpush3.bf16.msra.mxu0 %v1556_v34 }
  0xa3   : > { %1561 = vmatprep.subr.bf16.mxu0 %v1560_v37 }
  0xa6   : > { %1563 = vmatpush3.bf16.msra.mxu0 %v1560_v37  ;;  %v308_v37 = vld [vmem:[#allocation5 + $0x28] sm:$0xff] }
  0xa7   : > { %1565 = vmatprep.subr.bf16.mxu0 %v1564_v41 }
  0xaa   : > { %1567 = vmatpush3.bf16.msra.mxu0 %v1564_v41  ;;  %v1603_v41 = vpack.c.bf16 %v308_v37, %v307_v36 }
  0xab   : > { %1569 = vmatprep.subr.bf16.mxu0 %v1568_v45 }
  0xae   : > { %1571 = vmatpush3.bf16.msra.mxu0 %v1568_v45  ;;  %v1606_v45 = vpack.c.bf16 %v310_v43, %v309_v42 }
  0xb1   : > { %1348 = vmatmul.mubr.f32.vlgmr.msra.gmra.mrb[0].mxu0 %v567_v48 }
  0xb2   : > { %1350 = vmatprep.mubr.f32.mxu0 %v569_v49  ;;  %v313_v49 = vld [vmem:[#allocation5 + $0x50] sm:$0xff] }
  0xb3   : > { %v1612_v51 = vpack.c.bf16 %v314_v50, %v313_v49 }
  0xb5   : > { %1351 = vmatmul.mubr.f32.gmra.mrb[2].mxu0 %v568_v47  ;;  %v312_v47 = vld [vmem:[#allocation5 + $0x48] sm:$0xff] }
  0xb6   : > { %v1609_v48 = vpack.c.bf16 %v312_v47, %v311_v46 }
 0x184   : > { %v1349_v60 = vpop.f32.mrb[0].mxu0 }
 0x185   : > { %v670_v61 = vadd.f32 %v1349_v60, %v1115_v59  ;;  %v640_v62 = vpop.f32.mrb[1].mxu0  ;;  %v337_v60 = vld [vmem:[#allocation5 + $0x100] sm:$0xff] }
 0x186   : > { %v669_v1 = vadd.f32 %v1115_v59, %v640_v62 }
 0x187   : > { %vm674_vm3 = vcmp.gt.f32.partialorder %v670_v61, 0.0  ;;  %v678_v2 = vmul.f32 0.01, %v670_v61 }
 0x188   : > { %vm673_vm5 = vcmp.gt.f32.partialorder %v669_v1, 0.0  ;;  %v677_v5 = vmul.f32 0.01, %v669_v1  ;;  %v1352_v6 = vpop.f32.mrb[2].mxu0 }
 0x189   : > { %v2076_v7 = vsel %vm674_vm3, %v670_v61, %v678_v2  ;;  %v672_v8 = vadd.f32 %v1352_v6, %v1115_v59  ;;  %v650_v9 = vpop.f32.mrb[3].mxu0  ;;  %v338_v61 = vld [vmem:[#allocation5 + $0x108] sm:$0xff]  ;;  %v344_v6 = vld [vmem:[#allocation5 + $0x138] sm:$0xff] }
 0x18a   : > { %v872_v12 = vrot.slane %v2076_v7, 2  ;;  %v2079_v13 = vsel %vm673_vm5, %v669_v1, %v677_v5  ;;  %v671_v14 = vadd.f32 %v1115_v59, %v650_v9  ;;  %v702_v18 = vrot.slane %v2076_v7, 1  ;;  %v340_v1 = vld [vmem:[#allocation5 + $0x118] sm:$0xff]  ;;  %v345_v9 = vld [vmem:[#allocation5 + $0x140] sm:$0xff] }
 0x18b   : > { %v693_v16 = vsel %vm360_vm4, %v2079_v13, 0.0  ;;  %vm676_vm7 = vcmp.gt.f32.partialorder %v672_v8, 0.0  ;;  %v680_v17 = vmul.f32 0.01, %v672_v8  ;;  %v1618_v59 = vpack.c.bf16 %v318_v57, %v317_v55 }
 0x18c   : > { %v871_v19 = vrot.slane %v693_v16, 2  ;;  %vm675_vm8 = vcmp.gt.f32.partialorder %v671_v14, 0.0  ;;  %v679_v20 = vmul.f32 0.01, %v671_v14  ;;  %v701_v21 = vrot.slane %v693_v16, 1  ;;  %v349_v16 = vld [vmem:[#allocation5 + $0x160] sm:$0xff] }
 0x18d   : > { %v684_v22 = vsel %vm676_vm7, %v672_v8, %v680_v17  ;;  %v1621_v62 = vpack.c.bf16 %v338_v61, %v337_v60  ;;  %v1624_v2 = vpack.c.bf16 %v340_v1, %v339_v63  ;;  %v1627_v5 = vpack.c.bf16 %v342_v4, %v341_v3  ;;  %v350_v17 = vld [vmem:[#allocation5 + $0x168] sm:$0xff] }
 0x18e   : > { %v696_v25 = vsel %vm367_vm6, %v684_v22, 0.0  ;;  %v2086_v26 = vsel %vm675_vm8, %v671_v14, %v679_v20  ;;  %v703_v27 = vsel %vm380_vm0, %v701_v21, %v702_v18  ;;  %v2090_v28 = vsel %vm562_vm1, %v871_v19, %v872_v12  ;;  %v348_v14 = vld [vmem:[#allocation5 + $0x158] sm:$0xff]  ;;  %v351_v19 = vld [vmem:[#allocation5 + $0x170] sm:$0xff] }
 0x18f   : > { %1386 = vmatmul.mubr.f32.vlgmr.msra.gmra.mrb[0].mxu1 %v703_v27  ;;  %v704_v29 = vrot.slane %v2086_v26, 1  ;;  %v706_v30 = vrot.slane %v696_v25, 1  ;;  %v874_v31 = vrot.slane %v2086_v26, 2  ;;  %v876_v32 = vrot.slane %v696_v25, 2  ;;  %v352_v20 = vld [vmem:[#allocation5 + $0x178] sm:$0xff] }
 0x190   : > { %1598 = vmatpush3.bf16.msra.mxu1 %v1597_v15  ;;  %1388 = vmatprep.mubr.msk.f32.mxu1 %vm1866_vm2, %v1867_v56  ;;  %v1630_v8 = vpack.c.bf16 %v344_v6, %v343_v58  ;;  %v1642_v21 = vpack.c.bf16 %v352_v20, %v351_v19 }
 0x191   : > { %1599 = vmatprep.subr.bf16.mxu1 %v1865_v0  ;;  %v705_v34 = vsel %vm380_vm0, %v702_v18, %v704_v29  ;;  %v707_v35 = vsel %vm380_vm0, %v704_v29, %v706_v30  ;;  %v2100_v38 = vsel %vm562_vm1, %v872_v12, %v874_v31  ;;  %v2103_v40 = vsel %vm562_vm1, %v874_v31, %v876_v32 }
 0x192   : > { %v1639_v18 = vpack.c.bf16 %v350_v17, %v349_v16 }
 0x193   : > { %1389 = vmatmul.mubr.f32.gmra.mrb[2].mxu1 %v705_v34 }
 0x194   : > { %1601 = vmatpush3.bf16.msra.mxu1 %v1600_v33  ;;  %1391 = vmatprep.mubr.msk.f32.mxu1 %vm1866_vm2, %v1867_v56 }
 0x195   : > { %1602 = vmatprep.subr.bf16.mxu1 %v1865_v0 }
 0x197   : > { %1392 = vmatmul.mubr.f32.gmra.mrb[4].mxu1 %v707_v35 }
 0x198   : > { %1604 = vmatpush3.bf16.msra.mxu1 %v1603_v41  ;;  %1426 = vmatprep.mubr.msk.f32.mxu1 %vm1866_vm2, %v1867_v56 }
 0x199   : > { %1605 = vmatprep.subr.bf16.mxu1 %v1865_v0 }
 0x19c   : > { %1607 = vmatpush3.bf16.msra.mxu1 %v1606_v45 }
 0x19d   : > { %1608 = vmatprep.subr.bf16.mxu1 %v1865_v0 }
 0x1a0   : > { %1610 = vmatpush3.bf16.msra.mxu1 %v1609_v48 }
 0x1a1   : > { %1611 = vmatprep.subr.bf16.mxu1 %v1865_v0 }
 0x1a4   : > { %1613 = vmatpush3.bf16.msra.mxu1 %v1612_v51 }
 0x1a5   : > { %1614 = vmatprep.subr.bf16.mxu1 %v1865_v0 }
 0x1a8   : > { %1616 = vmatpush3.bf16.msra.mxu1 %v1615_v54 }
 0x1a9   : > { %1617 = vmatprep.subr.bf16.mxu1 %v1865_v0 }
 0x1ac   : > { %1619 = vmatpush3.bf16.msra.mxu1 %v1618_v59 }
 0x1ad   : > { %1620 = vmatprep.subr.bf16.mxu1 %v1865_v0 }
 0x1af   : > { %1427 = vmatmul.mubr.msk.f32.vlgmr.msra.gmra.mrb[0].mxu1 %vm360_vm4, %v2079_v13  ;;  %v347_v13 = vld [vmem:[#allocation5 + $0x150] sm:$0xff] }
 0x1b0   : > { %1622 = vmatpush3.bf16.msra.mxu1 %v1621_v62  ;;  %1429 = vmatprep.mubr.msk.f32.mxu1 %vm1866_vm2, %v1867_v56  ;;  %v1636_v15 = vpack.c.bf16 %v348_v14, %v347_v13 }
 0x1b1   : > { %1623 = vmatprep.subr.bf16.mxu1 %v1865_v0 }
 0x1b3   : > { %1430 = vmatmul.mubr.f32.gmra.mrb[2].mxu1 %v2076_v7  ;;  %v346_v7 = vld [vmem:[#allocation5 + $0x148] sm:$0xff] }
 0x1b4   : > { %1625 = vmatpush3.bf16.msra.mxu1 %v1624_v2  ;;  %1432 = vmatprep.mubr.msk.f32.mxu1 %vm1866_vm2, %v1867_v56  ;;  %v1633_v12 = vpack.c.bf16 %v346_v7, %v345_v9 }
 0x1b5   : > { %1626 = vmatprep.subr.bf16.mxu1 %v1865_v0 }
 0x1b7   : > { %1433 = vmatmul.mubr.f32.gmra.mrb[4].mxu1 %v2086_v26 }
 0x1b8   : > { %1628 = vmatpush3.bf16.msra.mxu1 %v1627_v5  ;;  %1467 = vmatprep.mubr.msk.f32.mxu1 %vm1866_vm2, %v1867_v56 }
 0x1b9   : > { %1629 = vmatprep.subr.bf16.mxu1 %v1865_v0 }
 0x1bc   : > { %1631 = vmatpush3.bf16.msra.mxu1 %v1630_v8 }
 0x1bd   : > { %1632 = vmatprep.subr.bf16.mxu1 %v1865_v0 }
 0x1c0   : > { %1634 = vmatpush3.bf16.msra.mxu1 %v1633_v12 }
 0x1c1   : > { %1635 = vmatprep.subr.bf16.mxu1 %v1865_v0 }
 0x1c4   : > { %1637 = vmatpush3.bf16.msra.mxu1 %v1636_v15 }
 0x1c5   : > { %1638 = vmatprep.subr.bf16.mxu1 %v1865_v0 }
 0x1c8   : > { %1640 = vmatpush3.bf16.msra.mxu1 %v1639_v18 }
 0x1c9   : > { %1641 = vmatprep.subr.bf16.mxu1 %v1865_v0  ;;  %v1117_v0 = vld [vmem:[%s2206_s4] ss:$0 sm:$0xff] }
 0x1cc   : > { %1643 = vmatpush3.bf16.msra.mxu1 %v1642_v21 }
 0x1cf   : > { %1468 = vmatmul.mubr.f32.vlgmr.msra.gmra.mrb[0].mxu1 %v2090_v28 }
 0x1d0   : > { %1470 = vmatprep.mubr.msk.f32.mxu1 %vm1866_vm2, %v1867_v56 }
 0x1d3   : > { %1471 = vmatmul.mubr.f32.gmra.mrb[2].mxu1 %v2100_v38 }
 0x1d4   : > { %1473 = vmatprep.mubr.msk.f32.mxu1 %vm1866_vm2, %v1867_v56 }
 0x1d7   : > { %1474 = vmatmul.mubr.f32.gmra.mrb[4].mxu1 %v2103_v40 }
 0x2a2   : > { %v947_v22 = vpop.f32.mrb[0].mxu1 }
 0x2a3   : > { %v968_v23 = vrot.slane %v947_v22, 6  ;;  %v1469_v24 = vpop.f32.mrb[1].mxu1 }
 0x2a5   : > { %v977_v25 = vadd.f32 %v968_v23, %v2030_v10 }
 0x2a6   : > { %v952_v26 = vpop.f32.mrb[2].mxu1 }
 0x2a7   : > { %v987_v27 = vadd.f32 %v1117_v0, %v977_v25  ;;  %v969_v28 = vrot.slane %v952_v26, 6  ;;  %v1472_v29 = vpop.f32.mrb[3].mxu1 }
 0x2a9   : > { %vm991_vm10 = vcmp.gt.f32.partialorder %v987_v27, 0.0  ;;  %v995_v56 = vmul.f32 0.01, %v987_v27  ;;  %v970_v30 = vsel %vm967_vm9, %v968_v23, %v969_v28 }
 0x2aa   : > { %v978_v31 = vadd.f32 %v970_v30, %v2033_v11  ;;  %v957_v32 = vpop.f32.mrb[4].mxu1 }
 0x2ab   : > { %v999_v33 = vsel %vm991_vm10, %v987_v27, %v995_v56  ;;  %v971_v34 = vrot.slane %v957_v32, 6  ;;  %v1475_v35 = vpop.f32.mrb[5].mxu1 }
 0x2ac   : > { %1003 = vst [vmem:[%s247_s16 - $0x2] sm:$0xfc] %v999_v33  ;;  %v988_v36 = vadd.f32 %v1117_v0, %v978_v31 }
 0x2ad   : > { %v972_v37 = vsel %vm967_vm9, %v969_v28, %v971_v34  ;;  %v980_v10 = vadd.f32 %v971_v34, %v2044_v44 }
 0x2ae   : > { %vm992_vm11 = vcmp.gt.f32.partialorder %v988_v36, 0.0  ;;  %v996_v38 = vmul.f32 0.01, %v988_v36  ;;  %v979_v40 = vadd.f32 %v972_v37, %v2040_v39 }
 0x2af   : > { %v990_v41 = vadd.f32 %v1117_v0, %v980_v10 }
 0x2b0   : > { %v1000_v42 = vsel %vm992_vm11, %v988_v36, %v996_v38  ;;  %v989_v11 = vadd.f32 %v1117_v0, %v979_v40 }
 0x2b1   : > { %1004 = vst [vmem:[%s247_s16 + $0x6] sm:$0xff] %v1000_v42  ;;  %vm994_vm12 = vcmp.gt.f32.partialorder %v990_v41, 0.0  ;;  %v998_v43 = vmul.f32 0.01, %v990_v41 }
 0x2b2   : > { %vm993_vm13 = vcmp.gt.f32.partialorder %v989_v11, 0.0  ;;  %v997_v44 = vmul.f32 0.01, %v989_v11 }
 0x2b3   : > { %v1002_v39 = vsel %vm994_vm12, %v990_v41, %v998_v43 }
 0x2b4   : > { %v1001_v45 = vsel %vm993_vm13, %v989_v11, %v997_v44  ;;  %1006 = vst [vmem:[%s247_s16 + $0x16] sm:$0x3] %v1002_v39 }
 0x2b5   : > { %1005 = vst [vmem:[%s247_s16 + $0xe] sm:$0xff] %v1001_v45 }
 0x2b6   : > { %1802 = shalt.err (!%p1799_p11)
}
 0x2b7   : > { %s1803_s9 = scalar_lea.hbm %s2157_s22, 384  ;;  %s1807_s13 = scalar_lea.hbm %s2207_s5, 768 }
 0x2b8   : > { %p1804_p13 = scmp.ne.s32.totalorder %s2157_s22, %s1803_s9  ;;  %p1808_p6 = scmp.lt.u32.totalorder %s2157_s22, %s2207_s5 }
 0x2b9   : > { %p1809_p9 = scmp.lt.u32.totalorder %s1807_s13, %s1803_s9  ;;  %p1811_p12 = scmp.lt.u32.totalorder %s1803_s9, %s2157_s22 }
 0x2ba   : > { %p1805_p5 = pnand %p1804_p13, %p2220_p1 }
 0x2bb   : > { %p1810_p10 = por %p1809_p9, %p1808_p6 }
 0x2bc   : > { %p1806_p0 = pneg %p1805_p5 }
 0x2bd   : > { %p1812_p2 = por %p1811_p12, %p1810_p10 }
 0x2bf   : > { %p1813_p3 = pnand %p1812_p2, %p1806_p0 }
 0x2c1   : > { %1816 = shalt.err (!%p1813_p3)
}
 0x2c2   : > { %s1869_s16 = smov 128   ;;  %s1870_s17 = smov 8  }
 0x2c3   : > { %1674 = dma.vmem_to_hbm [thread:$0]  (%p2220_p1), %s2152_s7, 384, %s2157_s22, %s2161_s30, %s1869_s16, %s1869_s16, %s1870_s17  }
 0x2c4 PF: > { %p1691_p4 = scmp.ge.s32.totalorder %s1859_s21, 2  ;;  %s1036_s23 = sand.u32 1, %s1847_s18  }
 0x2c5   : > { %p2221_p7 = scmp.ne.s32.totalorder %s2212_s29, 0  ;;  %s1037_s6 = scalar_lea.sflag [#allocation4], %s1036_s23 }
 0x2c7   : > { %p1684_p8 = pnand %p1691_p4, %p2221_p7 }
 0x2c9   : > { %1842 = dma.done.wait (!%p1684_p8), %s1037_s6, 384  }
 0x2ca   : > { %1844 = vsyncadd (!%p1684_p8), %s1037_s6, 4294966912  ;;  %p17_p11 = scmp.ge.s32.totalorder %s1926_s24, 4   ;;  %s2222_s18 = smov %s1851_s19 }
 0x2cb   : > { %s2223_s19 = smov %s1855_s20  ;;  %s2224_s20 = smov %s1937_s27 }
 0x2cc   : > { %s2225_s21 = smov %s1926_s24  ;;  %19 = sbr.rel (!%p17_p11) target bundleno = 5 (0x5), region = 88 }
 0x2d3   :  { %1042 = vsyncpa [#allocation3], 1 }
 0x2d4   :  { %1044 = vsyncpa [#allocation3 + $0x1], 1 }
 0x2d5   :  { %1045 = vsyncpa [#allocation6], 1 }
 0x2d6   :  { %1046 = vsyncpa [#allocation4], 1 }
 0x2d7   :  { %1048 = vsyncpa [#allocation4 + $0x1], 1 }

</bundles_post_ra>
